<compile_context>
chip_gen: v5e
topology: v5e:2x2
jax: 0.10.0
libtpu: 0.0.40
codegen_flags: <defaults>
</compile_context>

<pallas_src>
import functools

import jax
import jax.numpy as jnp
from jax.experimental import pallas as pl
from jax.experimental.pallas import tpu as pltpu

# Effectively -inf, but 0 * _NEG_LARGE stays finite, so zero-coefficient
# (padding) rows of the candidate buffer never poison the final reduction.
_NEG_LARGE = float(jnp.finfo(jnp.float32).min)


def _round_up(x, m):
    return ((x + m - 1) // m) * m


def _vmem_limit_bytes(frac=0.8, default=48 * 1024 * 1024):
    """~80% of this chip's physical VMEM (v5e/v6e ~102 MiB, v7x ~51 MiB)."""
    try:
        cap = getattr(pltpu.get_tpu_info(), "vmem_capacity_bytes", None)
        if cap:
            return int(frac * cap)
    except Exception:
        pass
    return default


def _he2rna_kernel(xt_ref, mcol_ref, w0t_ref, b0_ref, w1t_ref, b1_ref,
                   coeff_ref, o_ref, cand_ref, *, k_max, compute_dtype,
                   unroll_threshold):
    """One (batch, C_out-tile, N-chunk) grid step.

    xt_ref   : (1, n_chunk, C_in) staged in compute_dtype.
    mcol_ref : (1, n_chunk, 1) f32 in {1: kept tile, 0: empty tile, -1: N pad}.
    w0t_ref  : (C_in, H),    b0_ref: (1, H)        -- first 1x1 conv.
    w1t_ref  : (H, co_tile), b1_ref: (1, co_tile)  -- second 1x1 conv.
    coeff_ref: (1, k_pad, 1) f32 folded positional-mask / 1/den_k / 1/len(ks)
               weights: pred = sum_j topk_j * coeff_j.
    o_ref    : (1, 1, co_tile) lane-dense output block (written on last chunk).
    cand_ref : (k_pad, co_tile) f32 scratch -- running top-k_max, sorted desc.
    """
    n_id = pl.program_id(2)
    last = pl.num_programs(2) - 1

    @pl.when(n_id == 0)
    def _():
        cand_ref[...] = jnp.full_like(cand_ref, _NEG_LARGE)

    x = xt_ref[0]                                    # (n_chunk, C_in)
    mcol = mcol_ref[0]                               # (n_chunk, 1) f32

    # kernel_size=1 convs == channel matmuls on the MXU, f32 accumulation.
    h = jnp.dot(x, w0t_ref[...], preferred_element_type=jnp.float32) + b0_ref[...]
    h = jnp.maximum(h, 0.0)
    y = jnp.dot(h.astype(compute_dtype), w1t_ref[...],
                preferred_element_type=jnp.float32) + b1_ref[...]   # (n_chunk, co)
    # mask: keep (1), zero empty tiles (0), exclude N-padding rows (-1).
    y = jnp.where(mcol > 0.5, y, jnp.where(mcol < -0.5, _NEG_LARGE, 0.0))

    # Merge this chunk into the running top-k_max.  Knockout selection keeps
    # exact tie/duplicate semantics (masked zeros are exact duplicates).
    work = jnp.concatenate([cand_ref[...], y], axis=0)   # (k_pad+n_chunk, co)
    n_rows = work.shape[0]
    row_col = jax.lax.broadcasted_iota(jnp.int32, (n_rows, 1), 0)   # hoisted

    def select_one(j, w):
        m = jnp.max(w, axis=0, keepdims=True)                        # (1, co)
        cand_ref[pl.ds(j, 1), :] = m
        # Knock out exactly the first occurrence of the max per channel.
        # TODO(synk): try fusing max + first-index into one reduce (argmax)
        # to drop one (rows, co) pass per step once Mosaic lowering is verified.
        first = jnp.min(jnp.where(w == m, row_col, n_rows), axis=0,
                        keepdims=True)                               # (1, co)
        return jnp.where(row_col == first, _NEG_LARGE, w)

    if k_max <= unroll_threshold:
        for j in range(k_max):                       # full LLO visibility
            work = select_one(j, work)
    else:
        work = jax.lax.fori_loop(0, k_max, select_one, work, unroll=4)

    @pl.when(n_id == last)
    def _():
        coeff = coeff_ref[0]                                          # (k_pad, 1)
        o_ref[0] = jnp.sum(cand_ref[...] * coeff, axis=0, keepdims=True)


def he2rna_forward(x, w0, b0, w1, b1, ks, *, compute_dtype=jnp.float32,
                   co_tile=None, n_chunk=None, unroll_threshold=8):
    """x: (B, C_in, N) f32; w0: (H, C_in); b0: (H,); w1: (C_out, H); b1: (C_out,)
    -> (B, C_out) f32 (eval-mode HE2RNA forward)."""
    bsz, c_in, n = x.shape
    hdim = w0.shape[0]
    c_out = w1.shape[0]
    ks_sorted = tuple(sorted(int(k) for k in ks))
    k_max = ks_sorted[-1]
    nks = len(ks_sorted)
    if k_max > n:
        raise ValueError(f"max(ks)={k_max} must be <= number of tiles n={n}")

    # ---- tiling: lane-dense C_out (padded to co_tile multiples of 128),
    #      N streamed in sublane-aligned chunks, top-k buffer padded to 8 ----
    if co_tile is None:
        co_tile = min(512, _round_up(c_out, 128))
    co_tile = _round_up(co_tile, 128)
    co_pad = _round_up(c_out, co_tile)
    n_co = co_pad // co_tile

    if n_chunk is None:
        n_chunk = min(512, _round_up(n, 8))
    n_chunk = _round_up(n_chunk, 8)
    n_pad = _round_up(n, n_chunk)
    n_chunks = n_pad // n_chunk

    k_pad = _round_up(k_max, 8)

    # ---- mask / coefficient tables from the f32 input, so the >0 test is
    #      independent of the (possibly bf16) staging dtype ----
    x = x.astype(jnp.float32)
    mask = (jnp.max(x, axis=1) > 0).astype(jnp.float32)           # (B, N)
    mcol = jnp.pad(mask, ((0, 0), (0, n_pad - n)),
                   constant_values=-1.0)[:, :, None]              # (B, n_pad, 1)

    # pred = sum_k (sum_{j<k} t_j*mask_j) / den_k / |ks|
    #      = sum_j t_j * coeff_j, coeff_j = mask_j * sum_{k>j} 1/(den_k*|ks|)
    dens = jnp.stack([jnp.sum(mask[:, :k], axis=1) for k in ks_sorted],
                     axis=1)                                      # (B, nks)
    inv_dens = 1.0 / (dens * float(nks))      # inf if den_k==0 (ref gives NaN)
    jj = jnp.arange(k_max, dtype=jnp.int32)
    kk = jnp.asarray(ks_sorted, dtype=jnp.int32)
    gt = (kk[None, :] > jj[:, None]).astype(jnp.float32)          # (k_max, nks)
    coeff = mask[:, :k_max] * jnp.einsum('bi,ji->bj', inv_dens, gt)
    coeff = jnp.pad(coeff, ((0, 0), (0, k_pad - k_max)))[:, :, None]  # (B,k_pad,1)

    # ---- lane-dense operand layouts, staged in compute_dtype (bf16 halves
    #      HBM->VMEM traffic; biases stay f32, added post-matmul) ----
    xt = jnp.transpose(x, (0, 2, 1))                              # (B, N, C_in)
    xt = jnp.pad(xt, ((0, 0), (0, n_pad - n), (0, 0))).astype(compute_dtype)
    w0t = jnp.transpose(w0).astype(compute_dtype)                 # (C_in, H)
    w1t = jnp.pad(jnp.transpose(w1),
                  ((0, 0), (0, co_pad - c_out))).astype(compute_dtype)  # (H, co_pad)
    b0r = jnp.reshape(b0, (1, hdim)).astype(jnp.float32)
    b1r = jnp.reshape(jnp.pad(b1, (0, co_pad - c_out)),
                      (1, co_pad)).astype(jnp.float32)

    kernel = functools.partial(_he2rna_kernel, k_max=k_max,
                               compute_dtype=compute_dtype,
                               unroll_threshold=unroll_threshold)

    # TODO(synk): cache h=(n_chunk, H) across the co-tile axis (it is
    # recomputed n_co times per chunk) once production C_out needs >1 tile.
    out = pl.pallas_call(
        kernel,
        out_shape=jax.ShapeDtypeStruct((bsz, 1, co_pad), jnp.float32),
        grid_spec=pltpu.PrefetchScalarGridSpec(
            num_scalar_prefetch=0,
            grid=(bsz, n_co, n_chunks),
            in_specs=[
                pl.BlockSpec((1, n_chunk, c_in), lambda b, c, s: (b, s, 0)),
                pl.BlockSpec((1, n_chunk, 1), lambda b, c, s: (b, s, 0)),
                pl.BlockSpec((c_in, hdim), lambda b, c, s: (0, 0)),
                pl.BlockSpec((1, hdim), lambda b, c, s: (0, 0)),
                pl.BlockSpec((hdim, co_tile), lambda b, c, s: (0, c)),
                pl.BlockSpec((1, co_tile), lambda b, c, s: (0, c)),
                pl.BlockSpec((1, k_pad, 1), lambda b, c, s: (b, 0, 0)),
            ],
            out_specs=pl.BlockSpec((1, 1, co_tile), lambda b, c, s: (b, 0, c)),
            scratch_shapes=[pltpu.VMEM((k_pad, co_tile), jnp.float32)],
        ),
        compiler_params=pltpu.CompilerParams(
            dimension_semantics=("parallel", "parallel", "arbitrary"),
            vmem_limit_bytes=_vmem_limit_bytes()),
    )(xt, mcol, w0t, b0r, w1t, b1r, coeff)
    return out[:, 0, :c_out]


def he2rna_reference(x, w0, b0, w1, b1, ks):
    """Pure-JAX reference mirroring the PyTorch eval-mode forward (f32)."""
    hi = jax.lax.Precision.HIGHEST
    mask = (jnp.max(x, axis=1, keepdims=True) > 0).astype(jnp.float32)  # (B,1,N)
    h = jax.nn.relu(jnp.einsum('hc,bcn->bhn', w0, x, precision=hi)
                    + b0[None, :, None])
    y = jnp.einsum('oh,bhn->bon', w1, h, precision=hi) + b1[None, :, None]
    y = y * mask
    t = -jnp.sort(-y, axis=-1)                                          # desc
    pred = jnp.zeros(y.shape[:2], jnp.float32)
    for k in ks:
        numk = jnp.sum(t[:, :, :k] * mask[:, :, :k], axis=-1)
        denk = jnp.sum(mask[:, :, :k], axis=-1)
        pred = pred + (numk / denk) / float(len(ks))
    return pred


if __name__ == "__main__":
    # Small shapes consistent with the module: input_dim=4, layers=[8],
    # output_dim=6, N=16 tiles, batch=2.
    B, C_IN, N = 2, 4, 16
    HIDDEN, C_OUT = 8, 6

    key = jax.random.PRNGKey(0)
    kx, k0, k1, kb0, kb1 = jax.random.split(key, 5)

    x = jax.random.normal(kx, (B, C_IN, N), dtype=jnp.float32)
    # Make tile 1 and the last 3 tiles "empty" (all channels <= 0): exercises
    # the y*mask zeroing, positional mask weights and duplicate-zero top-k.
    for idx in (1, N - 3, N - 2, N - 1):
        x = x.at[:, :, idx].set(-jnp.abs(x[:, :, idx]) - 0.1)
    # Guarantee tile 0 is non-empty in every batch so sum(mask[:, :k]) > 0
    # (den == 0 -> NaN matches the reference but is not a useful check).
    x = x.at[:, 0, 0].set(jnp.abs(x[:, 0, 0]) + 0.5)

    w0 = 0.3 * jax.random.normal(k0, (HIDDEN, C_IN), dtype=jnp.float32)
    b0 = 0.1 * jax.random.normal(kb0, (HIDDEN,), dtype=jnp.float32)
    w1 = 0.3 * jax.random.normal(k1, (C_OUT, HIDDEN), dtype=jnp.float32)
    b1 = 0.1 * jax.random.normal(kb1, (C_OUT,), dtype=jnp.float32)

    # 1) f32, small ks -> fully-unrolled knockout, single N chunk.
    ks1 = [3, 5]
    out1 = jax.block_until_ready(he2rna_forward(x, w0, b0, w1, b1, ks1))
    ref1 = he2rna_reference(x, w0, b0, w1, b1, ks1)
    if not jnp.allclose(out1, ref1, rtol=1e-4, atol=1e-4, equal_nan=True):
        raise AssertionError(f"f32 unrolled mismatch:\n{out1}\nvs\n{ref1}")

    # 2) f32, k_max=16 -> fori_loop knockout; n_chunk=8 -> two streamed chunks
    #    exercising the running top-k merge across the N grid axis.
    ks2 = [4, 10, 16]
    out2 = jax.block_until_ready(
        he2rna_forward(x, w0, b0, w1, b1, ks2, n_chunk=8))
    ref2 = he2rna_reference(x, w0, b0, w1, b1, ks2)
    if not jnp.allclose(out2, ref2, rtol=1e-4, atol=1e-4, equal_nan=True):
        raise AssertionError(f"f32 streamed mismatch:\n{out2}\nvs\n{ref2}")

    # 3) bf16 staging (wrapper-side cast, f32 mask/accumulation), with an
    #    N chunk larger than N to exercise the padded-row sentinel path.
    out3 = jax.block_until_ready(
        he2rna_forward(x, w0, b0, w1, b1, ks1, compute_dtype=jnp.bfloat16,
                       n_chunk=24))
    if not jnp.allclose(out3, ref1, rtol=3e-2, atol=3e-2, equal_nan=True):
        raise AssertionError(f"bf16 mismatch:\n{out3}\nvs\n{ref1}")

    print("KERNEL_OK")
</pallas_src>

<mosaic_0001>
module attributes {stable_mosaic.version = 11 : i64} {
  func.func @_he2rna_kernel(%arg0: i32, %arg1: i32, %arg2: i32, %arg3: memref<1x16x4xf32, #tpu.memory_space<vmem>>, %arg4: memref<1x16x1xf32, #tpu.memory_space<vmem>>, %arg5: memref<4x8xf32, #tpu.memory_space<vmem>>, %arg6: memref<1x8xf32, #tpu.memory_space<vmem>>, %arg7: memref<8x128xf32, #tpu.memory_space<vmem>>, %arg8: memref<1x128xf32, #tpu.memory_space<vmem>>, %arg9: memref<1x8x1xf32, #tpu.memory_space<vmem>>, %arg10: memref<1x1x128xf32, #tpu.memory_space<vmem>>, %arg11: memref<8x128xf32, #tpu.memory_space<vmem>>) attributes {dimension_semantics = [#tpu.dimension_semantics<parallel>, #tpu.dimension_semantics<parallel>, #tpu.dimension_semantics<arbitrary>], iteration_bounds = array<i64: 2, 1, 1>, scalar_prefetch = 0 : i64, scratch_operands = 1 : i64, tpu.core_type = #tpu.core_type<tc>, window_params = [{transform_indices = @transform_0, window_bounds = array<i64: 1, 16, 4>}, {transform_indices = @transform_1, window_bounds = array<i64: 1, 16, 1>}, {pipeline_mode = #tpu.pipeline_mode<synchronous>, transform_indices = @transform_2, window_bounds = array<i64: 4, 8>}, {pipeline_mode = #tpu.pipeline_mode<synchronous>, transform_indices = @transform_3, window_bounds = array<i64: 1, 8>}, {transform_indices = @transform_4, window_bounds = array<i64: 8, 128>}, {transform_indices = @transform_5, window_bounds = array<i64: 1, 128>}, {transform_indices = @transform_6, window_bounds = array<i64: 1, 8, 1>}, {transform_indices = @transform_7, window_bounds = array<i64: 1, 1, 128>}]} {
    %c0_i32 = arith.constant 0 : i32
    %0 = arith.cmpi eq, %arg2, %c0_i32 : i32
    %1 = arith.extui %0 : i1 to i32
    %c0_i32_0 = arith.constant 0 : i32
    %2 = arith.cmpi ne, %1, %c0_i32_0 : i32
    scf.if %2 {
      %cst_46 = arith.constant -3.40282347E+38 : f32
      %104 = vector.broadcast %cst_46 : f32 to vector<8x128xf32>
      %c0_47 = arith.constant 0 : index
      %c0_48 = arith.constant 0 : index
      %105 = vector.load %arg11[%c0_47, %c0_48] : memref<8x128xf32, #tpu.memory_space<vmem>>, vector<8x128xf32>
      tpu.vector_store %arg11[%c0_47, %c0_48], %104 {strides = array<i32>} : memref<8x128xf32, #tpu.memory_space<vmem>>, vector<8x128xf32>,
    } else {
    }
    %c0 = arith.constant 0 : index
    %c0_1 = arith.constant 0 : index
    %c0_2 = arith.constant 0 : index
    %3 = vector.load %arg3[%c0, %c0_1, %c0_2] : memref<1x16x4xf32, #tpu.memory_space<vmem>>, vector<1x16x4xf32>
    %4 = vector.shape_cast %3 : vector<1x16x4xf32> to vector<16x4xf32>
    %c0_3 = arith.constant 0 : index
    %c0_4 = arith.constant 0 : index
    %c0_5 = arith.constant 0 : index
    %5 = vector.load %arg4[%c0_3, %c0_4, %c0_5] : memref<1x16x1xf32, #tpu.memory_space<vmem>>, vector<1x16x1xf32>
    %6 = vector.shape_cast %5 : vector<1x16x1xf32> to vector<16x1xf32>
    %c0_6 = arith.constant 0 : index
    %c0_7 = arith.constant 0 : index
    %7 = vector.load %arg5[%c0_6, %c0_7] : memref<4x8xf32, #tpu.memory_space<vmem>>, vector<4x8xf32>
    %cst = arith.constant dense<0.000000e+00> : vector<16x8xf32>
    %8 = tpu.matmul %4, %7, %cst {dimension_numbers = #tpu.dot_dimension_numbers<[1], [0], [0], [1], [0, 0, 1, 1], [], []>} : vector<16x4xf32>, vector<4x8xf32>, vector<16x8xf32> -> vector<16x8xf32>
    %c0_8 = arith.constant 0 : index
    %c0_9 = arith.constant 0 : index
    %9 = vector.load %arg6[%c0_8, %c0_9] : memref<1x8xf32, #tpu.memory_space<vmem>>, vector<1x8xf32>
    %10 = vector.broadcast %9 : vector<1x8xf32> to vector<16x8xf32>
    %11 = arith.addf %8, %10 : vector<16x8xf32>
    %cst_10 = arith.constant 0.000000e+00 : f32
    %12 = vector.broadcast %cst_10 : f32 to vector<16x8xf32>
    %13 = arith.maximumf %11, %12 : vector<16x8xf32>
    %c0_11 = arith.constant 0 : index
    %c0_12 = arith.constant 0 : index
    %14 = vector.load %arg7[%c0_11, %c0_12] : memref<8x128xf32, #tpu.memory_space<vmem>>, vector<8x128xf32>
    %cst_13 = arith.constant dense<0.000000e+00> : vector<16x128xf32>
    %15 = tpu.matmul %13, %14, %cst_13 {dimension_numbers = #tpu.dot_dimension_numbers<[1], [0], [0], [1], [0, 0, 1, 1], [], []>} : vector<16x8xf32>, vector<8x128xf32>, vector<16x128xf32> -> vector<16x128xf32>
    %c0_14 = arith.constant 0 : index
    %c0_15 = arith.constant 0 : index
    %16 = vector.load %arg8[%c0_14, %c0_15] : memref<1x128xf32, #tpu.memory_space<vmem>>, vector<1x128xf32>
    %17 = vector.broadcast %16 : vector<1x128xf32> to vector<16x128xf32>
    %18 = arith.addf %15, %17 : vector<16x128xf32>
    %cst_16 = arith.constant 5.000000e-01 : f32
    %19 = vector.broadcast %cst_16 : f32 to vector<16x1xf32>
    %20 = arith.cmpf ogt, %6, %19 : vector<16x1xf32>
    %cst_17 = arith.constant -5.000000e-01 : f32
    %21 = vector.broadcast %cst_17 : f32 to vector<16x1xf32>
    %22 = arith.cmpf olt, %6, %21 : vector<16x1xf32>
    %cst_18 = arith.constant -3.40282347E+38 : f32
    %cst_19 = arith.constant 0.000000e+00 : f32
    %23 = vector.broadcast %cst_18 : f32 to vector<16x1xf32>
    %24 = vector.broadcast %cst_19 : f32 to vector<16x1xf32>
    %25 = arith.select %22, %23, %24 : vector<16x1xi1>, vector<16x1xf32>
    %26 = vector.shape_cast %20 : vector<16x1xi1> to vector<16x1xi1>
    %27 = vector.broadcast %26 : vector<16x1xi1> to vector<16x128xi1>
    %28 = vector.shape_cast %25 : vector<16x1xf32> to vector<16x1xf32>
    %29 = vector.broadcast %28 : vector<16x1xf32> to vector<16x128xf32>
    %30 = arith.select %27, %18, %29 : vector<16x128xi1>, vector<16x128xf32>
    %c0_20 = arith.constant 0 : index
    %c0_21 = arith.constant 0 : index
    %31 = vector.load %arg11[%c0_20, %c0_21] : memref<8x128xf32, #tpu.memory_space<vmem>>, vector<8x128xf32>
    %32 = tpu.concatenate %31, %30 in 0 : vector<8x128xf32>, vector<16x128xf32> -> vector<24x128xf32>
    %33 = tpu.iota {dimensions = array<i32: 0>} : vector<24x1xi32>
    %cst_22 = arith.constant dense<0xFF800000> : vector<128xf32>
    %34 = vector.multi_reduction <maximumf>, %32, %cst_22 [0] : vector<24x128xf32> to vector<128xf32>
    %35 = vector.shape_cast %34 : vector<128xf32> to vector<1x128xf32>
    %c0_23 = arith.constant 0 : index
    %c0_24 = arith.constant 0 : index
    %36 = vector.load %arg11[%c0_23, %c0_24] : memref<8x128xf32, #tpu.memory_space<vmem>>, vector<1x128xf32>
    tpu.vector_store %arg11[%c0_23, %c0_24], %35 {strides = array<i32>} : memref<8x128xf32, #tpu.memory_space<vmem>>, vector<1x128xf32>,
    %37 = vector.broadcast %35 : vector<1x128xf32> to vector<24x128xf32>
    %38 = arith.cmpf oeq, %32, %37 : vector<24x128xf32>
    %c24_i32 = arith.constant 24 : i32
    %39 = vector.shape_cast %33 : vector<24x1xi32> to vector<24x1xi32>
    %40 = vector.broadcast %39 : vector<24x1xi32> to vector<24x128xi32>
    %41 = vector.broadcast %c24_i32 : i32 to vector<24x128xi32>
    %42 = arith.select %38, %40, %41 : vector<24x128xi1>, vector<24x128xi32>
    %cst_25 = arith.constant dense<2147483647> : vector<128xi32>
    %43 = vector.multi_reduction <minsi>, %42, %cst_25 [0] : vector<24x128xi32> to vector<128xi32>
    %44 = vector.shape_cast %43 : vector<128xi32> to vector<1x128xi32>
    %45 = vector.broadcast %33 : vector<24x1xi32> to vector<24x128xi32>
    %46 = vector.broadcast %44 : vector<1x128xi32> to vector<24x128xi32>
    %47 = arith.cmpi eq, %45, %46 : vector<24x128xi32>
    %cst_26 = arith.constant -3.40282347E+38 : f32
    %48 = vector.broadcast %cst_26 : f32 to vector<24x128xf32>
    %49 = arith.select %47, %48, %32 : vector<24x128xi1>, vector<24x128xf32>
    %cst_27 = arith.constant dense<0xFF800000> : vector<128xf32>
    %50 = vector.multi_reduction <maximumf>, %49, %cst_27 [0] : vector<24x128xf32> to vector<128xf32>
    %51 = vector.shape_cast %50 : vector<128xf32> to vector<1x128xf32>
    %c1 = arith.constant 1 : index
    %c0_28 = arith.constant 0 : index
    %52 = vector.load %arg11[%c1, %c0_28] : memref<8x128xf32, #tpu.memory_space<vmem>>, vector<1x128xf32>
    tpu.vector_store %arg11[%c1, %c0_28], %51 {strides = array<i32>} : memref<8x128xf32, #tpu.memory_space<vmem>>, vector<1x128xf32>,
    %53 = vector.broadcast %51 : vector<1x128xf32> to vector<24x128xf32>
    %54 = arith.cmpf oeq, %49, %53 : vector<24x128xf32>
    %c24_i32_29 = arith.constant 24 : i32
    %55 = vector.shape_cast %33 : vector<24x1xi32> to vector<24x1xi32>
    %56 = vector.broadcast %55 : vector<24x1xi32> to vector<24x128xi32>
    %57 = vector.broadcast %c24_i32_29 : i32 to vector<24x128xi32>
    %58 = arith.select %54, %56, %57 : vector<24x128xi1>, vector<24x128xi32>
    %cst_30 = arith.constant dense<2147483647> : vector<128xi32>
    %59 = vector.multi_reduction <minsi>, %58, %cst_30 [0] : vector<24x128xi32> to vector<128xi32>
    %60 = vector.shape_cast %59 : vector<128xi32> to vector<1x128xi32>
    %61 = vector.broadcast %33 : vector<24x1xi32> to vector<24x128xi32>
    %62 = vector.broadcast %60 : vector<1x128xi32> to vector<24x128xi32>
    %63 = arith.cmpi eq, %61, %62 : vector<24x128xi32>
    %cst_31 = arith.constant -3.40282347E+38 : f32
    %64 = vector.broadcast %cst_31 : f32 to vector<24x128xf32>
    %65 = arith.select %63, %64, %49 : vector<24x128xi1>, vector<24x128xf32>
    %cst_32 = arith.constant dense<0xFF800000> : vector<128xf32>
    %66 = vector.multi_reduction <maximumf>, %65, %cst_32 [0] : vector<24x128xf32> to vector<128xf32>
    %67 = vector.shape_cast %66 : vector<128xf32> to vector<1x128xf32>
    %c2 = arith.constant 2 : index
    %c0_33 = arith.constant 0 : index
    %68 = vector.load %arg11[%c2, %c0_33] : memref<8x128xf32, #tpu.memory_space<vmem>>, vector<1x128xf32>
    tpu.vector_store %arg11[%c2, %c0_33], %67 {strides = array<i32>} : memref<8x128xf32, #tpu.memory_space<vmem>>, vector<1x128xf32>,
    %69 = vector.broadcast %67 : vector<1x128xf32> to vector<24x128xf32>
    %70 = arith.cmpf oeq, %65, %69 : vector<24x128xf32>
    %c24_i32_34 = arith.constant 24 : i32
    %71 = vector.shape_cast %33 : vector<24x1xi32> to vector<24x1xi32>
    %72 = vector.broadcast %71 : vector<24x1xi32> to vector<24x128xi32>
    %73 = vector.broadcast %c24_i32_34 : i32 to vector<24x128xi32>
    %74 = arith.select %70, %72, %73 : vector<24x128xi1>, vector<24x128xi32>
    %cst_35 = arith.constant dense<2147483647> : vector<128xi32>
    %75 = vector.multi_reduction <minsi>, %74, %cst_35 [0] : vector<24x128xi32> to vector<128xi32>
    %76 = vector.shape_cast %75 : vector<128xi32> to vector<1x128xi32>
    %77 = vector.broadcast %33 : vector<24x1xi32> to vector<24x128xi32>
    %78 = vector.broadcast %76 : vector<1x128xi32> to vector<24x128xi32>
    %79 = arith.cmpi eq, %77, %78 : vector<24x128xi32>
    %cst_36 = arith.constant -3.40282347E+38 : f32
    %80 = vector.broadcast %cst_36 : f32 to vector<24x128xf32>
    %81 = arith.select %79, %80, %65 : vector<24x128xi1>, vector<24x128xf32>
    %cst_37 = arith.constant dense<0xFF800000> : vector<128xf32>
    %82 = vector.multi_reduction <maximumf>, %81, %cst_37 [0] : vector<24x128xf32> to vector<128xf32>
    %83 = vector.shape_cast %82 : vector<128xf32> to vector<1x128xf32>
    %c3 = arith.constant 3 : index
    %c0_38 = arith.constant 0 : index
    %84 = vector.load %arg11[%c3, %c0_38] : memref<8x128xf32, #tpu.memory_space<vmem>>, vector<1x128xf32>
    tpu.vector_store %arg11[%c3, %c0_38], %83 {strides = array<i32>} : memref<8x128xf32, #tpu.memory_space<vmem>>, vector<1x128xf32>,
    %85 = vector.broadcast %83 : vector<1x128xf32> to vector<24x128xf32>
    %86 = arith.cmpf oeq, %81, %85 : vector<24x128xf32>
    %c24_i32_39 = arith.constant 24 : i32
    %87 = vector.shape_cast %33 : vector<24x1xi32> to vector<24x1xi32>
    %88 = vector.broadcast %87 : vector<24x1xi32> to vector<24x128xi32>
    %89 = vector.broadcast %c24_i32_39 : i32 to vector<24x128xi32>
    %90 = arith.select %86, %88, %89 : vector<24x128xi1>, vector<24x128xi32>
    %cst_40 = arith.constant dense<2147483647> : vector<128xi32>
    %91 = vector.multi_reduction <minsi>, %90, %cst_40 [0] : vector<24x128xi32> to vector<128xi32>
    %92 = vector.shape_cast %91 : vector<128xi32> to vector<1x128xi32>
    %93 = vector.broadcast %33 : vector<24x1xi32> to vector<24x128xi32>
    %94 = vector.broadcast %92 : vector<1x128xi32> to vector<24x128xi32>
    %95 = arith.cmpi eq, %93, %94 : vector<24x128xi32>
    %cst_41 = arith.constant -3.40282347E+38 : f32
    %96 = vector.broadcast %cst_41 : f32 to vector<24x128xf32>
    %97 = arith.select %95, %96, %81 : vector<24x128xi1>, vector<24x128xf32>
    %cst_42 = arith.constant dense<0xFF800000> : vector<128xf32>
    %98 = vector.multi_reduction <maximumf>, %97, %cst_42 [0] : vector<24x128xf32> to vector<128xf32>
    %99 = vector.shape_cast %98 : vector<128xf32> to vector<1x128xf32>
    %c4 = arith.constant 4 : index
    %c0_43 = arith.constant 0 : index
    %100 = vector.load %arg11[%c4, %c0_43] : memref<8x128xf32, #tpu.memory_space<vmem>>, vector<1x128xf32>
    tpu.vector_store %arg11[%c4, %c0_43], %99 {strides = array<i32>} : memref<8x128xf32, #tpu.memory_space<vmem>>, vector<1x128xf32>,
    %c0_i32_44 = arith.constant 0 : i32
    %101 = arith.cmpi eq, %arg2, %c0_i32_44 : i32
    %102 = arith.extui %101 : i1 to i32
    %c0_i32_45 = arith.constant 0 : i32
    %103 = arith.cmpi ne, %102, %c0_i32_45 : i32
    scf.if %103 {
      %c0_46 = arith.constant 0 : index
      %c0_47 = arith.constant 0 : index
      %c0_48 = arith.constant 0 : index
      %104 = vector.load %arg9[%c0_46, %c0_47, %c0_48] : memref<1x8x1xf32, #tpu.memory_space<vmem>>, vector<1x8x1xf32>
      %105 = vector.shape_cast %104 : vector<1x8x1xf32> to vector<8x1xf32>
      %c0_49 = arith.constant 0 : index
      %c0_50 = arith.constant 0 : index
      %106 = vector.load %arg11[%c0_49, %c0_50] : memref<8x128xf32, #tpu.memory_space<vmem>>, vector<8x128xf32>
      %107 = vector.broadcast %105 : vector<8x1xf32> to vector<8x128xf32>
      %108 = arith.mulf %106, %107 : vector<8x128xf32>
      %cst_51 = arith.constant dense<0.000000e+00> : vector<128xf32>
      %109 = vector.multi_reduction <add>, %108, %cst_51 [0] : vector<8x128xf32> to vector<128xf32>
      %110 = vector.shape_cast %109 : vector<128xf32> to vector<1x128xf32>
      %c0_52 = arith.constant 0 : index
      %c0_53 = arith.constant 0 : index
      %c0_54 = arith.constant 0 : index
      %111 = vector.load %arg10[%c0_52, %c0_53, %c0_54] : memref<1x1x128xf32, #tpu.memory_space<vmem>>, vector<1x1x128xf32>
      %112 = vector.shape_cast %111 : vector<1x1x128xf32> to vector<1x128xf32>
      %113 = vector.shape_cast %110 : vector<1x128xf32> to vector<1x1x128xf32>
      tpu.vector_store %arg10[%c0_52, %c0_53, %c0_54], %113 {strides = array<i32>} : memref<1x1x128xf32, #tpu.memory_space<vmem>>, vector<1x1x128xf32>,
    } else {
    }
    return
  }
  func.func @transform_0(%arg0: i32, %arg1: i32, %arg2: i32) -> (i32, i32, i32) {
    %c0_i32 = arith.constant 0 : i32
    %c0_i32_0 = arith.constant 0 : i32
    return %arg0, %arg2, %c0_i32 : i32, i32, i32
  }
  func.func @transform_1(%arg0: i32, %arg1: i32, %arg2: i32) -> (i32, i32, i32) {
    %c0_i32 = arith.constant 0 : i32
    %c0_i32_0 = arith.constant 0 : i32
    return %arg0, %arg2, %c0_i32 : i32, i32, i32
  }
  func.func @transform_2(%arg0: i32, %arg1: i32, %arg2: i32) -> (i32, i32) {
    %c0_i32 = arith.constant 0 : i32
    %c0_i32_0 = arith.constant 0 : i32
    %c0_i32_1 = arith.constant 0 : i32
    return %c0_i32, %c0_i32_0 : i32, i32
  }
  func.func @transform_3(%arg0: i32, %arg1: i32, %arg2: i32) -> (i32, i32) {
    %c0_i32 = arith.constant 0 : i32
    %c0_i32_0 = arith.constant 0 : i32
    %c0_i32_1 = arith.constant 0 : i32
    return %c0_i32, %c0_i32_0 : i32, i32
  }
  func.func @transform_4(%arg0: i32, %arg1: i32, %arg2: i32) -> (i32, i32) {
    %c0_i32 = arith.constant 0 : i32
    %c0_i32_0 = arith.constant 0 : i32
    return %c0_i32, %arg1 : i32, i32
  }
  func.func @transform_5(%arg0: i32, %arg1: i32, %arg2: i32) -> (i32, i32) {
    %c0_i32 = arith.constant 0 : i32
    %c0_i32_0 = arith.constant 0 : i32
    return %c0_i32, %arg1 : i32, i32
  }
  func.func @transform_6(%arg0: i32, %arg1: i32, %arg2: i32) -> (i32, i32, i32) {
    %c0_i32 = arith.constant 0 : i32
    %c0_i32_0 = arith.constant 0 : i32
    %c0_i32_1 = arith.constant 0 : i32
    return %arg0, %c0_i32, %c0_i32_0 : i32, i32, i32
  }
  func.func @transform_7(%arg0: i32, %arg1: i32, %arg2: i32) -> (i32, i32, i32) {
    %c0_i32 = arith.constant 0 : i32
    %c0_i32_0 = arith.constant 0 : i32
    return %arg0, %c0_i32, %arg1 : i32, i32, i32
  }
}

</mosaic_0001>

<bundles_post_ra>
// kernel: tpu_custom_call.1
= control target key start
LH: loop header
LB: loop body
LE: loop exit
PB: predicated region body
PF: predicated region fallthrough
CT: control target
= control target key end

     0   :  { %12 = vsyncpa [#allocation4], 0  ;;  %s1182_s0 = inlined_call_operand.vmem [shape: f32[2,16,4], index: 0, kind: input, shape index: {}]   ;;  %s1183_s1 = inlined_call_operand.vmem [shape: f32[2,16,1], index: 1, kind: input, shape index: {}]   ;;  %s1184_s2 = inlined_call_operand.vmem [shape: f32[4,8], index: 2, kind: input, shape index: {}]   ;;  %s1185_s3 = inlined_call_operand.vmem [shape: f32[1,8], index: 3, kind: input, shape index: {}]   ;;  %s1186_s4 = inlined_call_operand.vmem [shape: f32[8,128], index: 4, kind: input, shape index: {}]   ;;  %s1187_s5 = inlined_call_operand.vmem [shape: f32[1,128], index: 5, kind: input, shape index: {}]   ;;  %s1188_s6 = inlined_call_operand.vmem [shape: f32[2,8,1], index: 6, kind: input, shape index: {}]   ;;  %s1189_s7 = inlined_call_operand.hbm [shape: f32[2,1,128], index: 7, kind: output, shape index: {}]  }
   0x1   :  { %14 = vsyncpa [#allocation4 + $0x1], 0  ;;  %s1035_s24 = smov 0   ;;  %s1037_s25 = smov 0  }
   0x2   :  { %s1039_s26 = smov 0   ;;  %s1041_s27 = smov 0  }
   0x3   :  { %s1043_s28 = smov 0   ;;  %s1045_s29 = smov 0  }
   0x4 LB: > { %s822_s30 = sadd.s32 4294967295, %s990_s29   ;;  %s823_s8 = sadd.s32 4294967294, %s990_s29   ;;  %s990_s29 = sphi %s1045_s29, %s20_s29   ;;  %s986_s28 = sphi %s1043_s28, %s1196_s28   ;;  %s982_s27 = sphi %s1041_s27, %s1195_s27   ;;  %s978_s26 = sphi %s1039_s26, %s1194_s26   ;;  %s974_s25 = sphi %s1037_s25, %s1193_s25   ;;  %s970_s24 = sphi %s1035_s24, %s1192_s24  }
   0x5   : > { %s39_s9 = sadd.s32 1, %s986_s28  ;;  %s224_s10 = sadd.s32 1, %s978_s26 }
   0x6   : > { %p41_p0 = scmp.ge.s32.totalorder %s39_s9, 2  ;;  %p234_p1 = scmp.ne.s32.totalorder %s978_s26, %s974_s25 }
   0x7   : > { %p235_p2 = scmp.eq.s32.totalorder %s822_s30, 1  ;;  %p240_p3 = scmp.ne.s32.totalorder %s974_s25, %s970_s24 }
   0x8   : > { %s1198_s9 = smov (%p41_p0, %s39_s9), 0  ;;  %p241_p5 = scmp.eq.s32.totalorder %s823_s8, 1 }
   0x9   : > { %p1075_p4 = por %p235_p2, %p234_p1  ;;  %s219_s12 = ssub.s32 %s986_s28, %s1198_s9 }
   0xa   : > { %p828_p6 = scmp.ge.s32.totalorder %s990_s29, 1  ;;  %p222_p7 = scmp.eq.s32.totalorder %s219_s12, 0 }
   0xb   : > { %p1082_p8 = por %p241_p5, %p240_p3  ;;  %p311_p9 = scmp.lt.s32.totalorder %s990_s29, 3 }
   0xc   : > { %s1088_s14 = scalar_select %p222_p7, %s978_s26, %s224_s10  }
   0xd   : > { %p312_p10 = pnand %p828_p6, %p311_p9 }
   0xe   : > { %p367_p11 = scmp.lt.s32.totalorder (!%p312_p10), %s982_s27, 1  ;;  %s688_s8 = scalar_lea.hbm (!%p312_p10), %s1189_s7, %s982_s27 }
   0xf   : > { %315 = sbr.rel (%p312_p10) target bundleno = 479 (0x1df), region = 48  ;;  %s692_s15 = sshll.u32 (!%p312_p10), %s688_s8, 4  ;;  %s693_s15 = int_to_ptr.hbm [resolvable:$true] %s692_s15 }
  0x14   : > { %v406_v0 = vld [vmem:[%s1184_s2] sm:$0xf]  ;;  %vm418_vm0 = vcmask 1043456   ;;  %s1095_s17 = scalar_select %p367_p11, %s982_s27, 1  ;;  %vm411_vm1 = vcmask 31744   ;;  %v992_v5 = vmov 0   ;;  %v511_v34 = vlaneseq }
  0x15   : > { %843 = vmatpush.msk.msra.mxu2 %vm418_vm0, %v406_v0  ;;  %834 = vmatpush.msk.msra.mxu0 %vm418_vm0, %v406_v0  ;;  %v447_v3 = vld [vmem:[%s1186_s4] sm:$0xff]  ;;  %v993_v9 = vmov 0.0   ;;  %vm452_vm6 = vcmask 64512   ;;  %v994_v19 = vmov -3.4028235e+38   ;;  %s932_s27 = scalar_lea.hbm %s1189_s7, 2 }
  0x16   : > { %s841_s18 = sshll.u32 %s1095_s17, 4  ;;  %474 = vmatpush.msra.mxu1 %v447_v3  ;;  %844 = vmatpush.msra.mxu3 %v447_v3  ;;  %v906_v12 = vld [vmem:[%s1185_s3] ss:$0 sm:$0xff]  ;;  %401 = vst [vmem:[#allocation2] sm:$0xff] %v994_v19  ;;  %v1113_v37 = vshrl.u32 %v511_v34, 7  ;;  %s833_s19 = sshll.u32 %s1095_s17, 3 }
  0x17   : > { %s374_s21 = scalar_lea.vmem %s1182_s0, %s841_s18  ;;  %s384_s10 = scalar_lea.vmem %s1183_s1, %s841_s18  ;;  %903 = vset.pattern.permute.xlu0 %v992_v5  ;;  %904 = vset.pattern.permute.xlu1 %v992_v5  ;;  %v907_v21 = vld [vmem:[%s1187_s5] ss:$0 sm:$0xff] }
  0x18   : > { %v403_v1 = vld [vmem:[%s374_s21 + $0x8] sm:$0xff]  ;;  %v402_v2 = vld [vmem:[%s374_s21] sm:$0xff]  ;;  %905 = vset.pattern.permute.xlu2 %v992_v5  ;;  %v1116_v40 = vadd.s32 8, %v1113_v37  ;;  %v1119_v42 = vadd.s32 16, %v1113_v37  ;;  %s396_s22 = scalar_lea.vmem %s1188_s6, %s833_s19  ;;  %s364_s17 = sand.u32 1, %s974_s25  }
  0x19   : > { %836 = vmatmul.msk.f32.vlgmr.msra.gmra.mxu2 %vm411_vm1, %v403_v1  ;;  %835 = vmatmul.msk.f32.vlgmr.msra.gmra.mxu0 %vm411_vm1, %v402_v2  ;;  %v404_v4 = vld [vmem:[%s384_s10] sm:$0xff]  ;;  %v405_v7 = vld [vmem:[%s384_s10 + $0x8] sm:$0xff]  ;;  %s365_s10 = scalar_lea.vmem [#allocation3], %s364_s17  ;;  %s679_s16 = scalar_lea.sflag [#allocation4], %s364_s17 }
  0x1a   : > { %vm482_vm2 = vcmp.gt.f32.partialorder %v404_v4, 0.5  ;;  %vm483_vm3 = vcmp.gt.f32.partialorder %v405_v7, 0.5  ;;  %vm484_vm4 = vcmp.lt.f32.partialorder %v404_v4, -0.5  ;;  %vm485_vm5 = vcmp.lt.f32.partialorder %v405_v7, -0.5  ;;  %v663_v61 = vld [vmem:[%s396_s22] sm:$0xff]  ;;  %s690_s12 = sshll.u32 %s365_s10, 4  ;;  %s691_s12 = int_to_ptr.vmem [resolvable:$true] %s690_s12 }
  0x1b   : > { %v488_v6 = vsel %vm482_vm2, 1, %v992_v5  ;;  %v489_v8 = vsel %vm483_vm3, 1, %v992_v5  ;;  %v486_v10 = vsel %vm484_vm4, -3.4028235e+38, %v993_v9  ;;  %v487_v11 = vsel %vm485_vm5, -3.4028235e+38, %v993_v9  ;;  %667 = vperm.xlu2 %905, %v663_v61  }
  0x1c   : > { %491 = vperm.xlu0 %903, %v488_v6   ;;  %494 = vperm.xlu1 %904, %v489_v8   ;;  %s926_s18 = sshra.s32 %s693_s15, 4  ;;  %s927_s18 = int_to_ptr.hbm [resolvable:$true] %s926_s18 }
  0x1d   : > { %s928_s19 = scalar_lea.hbm %s927_s18, 1  ;;  %p933_p1 = scmp.lt.s32.totalorder %s927_s18, %s1189_s7 }
  0x1e   : > { %p929_p12 = scmp.ne.s32.totalorder %s927_s18, %s928_s19  ;;  %p934_p2 = scmp.lt.s32.totalorder %s932_s27, %s928_s19 }
  0x20   : > { %p930_p13 = pnand %p929_p12, %p1075_p4  ;;  %p935_p3 = por %p934_p2, %p933_p1 }
  0x22   : > { %p931_p0 = pneg %p930_p13 }
  0x24   : > { %500 = vperm.xlu0 %903, %v486_v10   ;;  %505 = vperm.xlu1 %904, %v487_v11   ;;  %p936_p5 = pnand %p935_p3, %p931_p0 }
  0x8e   : > { %v492_v20 = vpop.permute.xlu0 %491  ;;  %v495_v22 = vpop.permute.xlu1 %494 }
  0x8f   : > { %vm496_vm7 = vcmp.eq.s32.totalorder %v492_v20, 1  ;;  %vm497_vm8 = vcmp.eq.s32.totalorder %v495_v22, 1 }
  0x96   : > { %v439_v13 = vpop.f32.mrf.mxu0  ;;  %v501_v25 = vpop.permute.xlu0 %500 }
  0x97   : > { %v440_v14 = vadd.f32 %v906_v12, %v439_v13  ;;  %v506_v30 = vpop.permute.xlu1 %505 }
  0x99   : > { %v445_v15 = vmax.f32 %v440_v14, 0.0 }
  0x9b   : > { %837 = vmatmul.msk.f32.vlgmr.msra.gmra.mxu1 %vm452_vm6, %v445_v15 }
  0x9c   : > { %v442_v16 = vpop.f32.mrf.mxu2 }
  0x9d   : > { %v443_v17 = vadd.f32 %v906_v12, %v442_v16 }
  0x9f   : > { %v446_v18 = vmax.f32 %v443_v17, 0.0 }
  0xa1   : > { %838 = vmatmul.msk.f32.vlgmr.msra.gmra.mxu3 %vm452_vm6, %v446_v18 }
 0x118   : > { %v476_v23 = vpop.f32.mrf.mxu1 }
 0x119   : > { %v477_v24 = vadd.f32 %v907_v21, %v476_v23 }
 0x11b   : > { %v508_v26 = vsel %vm496_vm7, %v477_v24, %v501_v25 }
 0x11c   : > { %v515_v29 = vmax.f32 %v508_v26, -3.4028235e+38 }
 0x124   : > { %v479_v27 = vpop.f32.mrf.mxu3 }
 0x125   : > { %v480_v28 = vadd.f32 %v907_v21, %v479_v27 }
 0x127   : > { %v509_v31 = vsel %vm497_vm8, %v480_v28, %v506_v30 }
 0x128   : > { %v516_v32 = vmax.f32 %v515_v29, %v509_v31 }
 0x12a   : > { %v517_v33 = vrot.slane %v516_v32, 4 }
 0x12c   : > { %v518_v35 = vmax.f32 %v516_v32, %v517_v33 }
 0x12e   : > { %v519_v36 = vrot.slane %v518_v35, 2 }
 0x130   : > { %v520_v38 = vmax.f32 %v518_v35, %v519_v36 }
 0x132   : > { %v521_v39 = vrot.slane %v520_v38, 1 }
 0x134   : > { %v522_v41 = vmax.f32 %v520_v38, %v521_v39 }
 0x136   : > { %523 = vst [vmem:[#allocation2] sm:$0x1] %v522_v41  ;;  %vm908_vm9 = vcmp.eq.f32.partialorder %v522_v41, -3.4028235e+38  ;;  %vm525_vm10 = vcmp.eq.f32.partialorder %v508_v26, %v522_v41  ;;  %vm526_vm11 = vcmp.eq.f32.partialorder %v509_v31, %v522_v41 }
 0x137   : > { %v527_v43 = vsel %vm908_vm9, %v1113_v37, 24  ;;  %v528_v44 = vsel %vm525_vm10, %v1116_v40, 24  ;;  %v529_v45 = vsel %vm526_vm11, %v1119_v42, 24 }
 0x138   : > { %vm530_vm12 = vcmp.lt.s32.totalorder %v527_v43, %v528_v44 }
 0x139   : > { %v531_v46 = vsel %vm530_vm12, %v527_v43, %v528_v44 }
 0x13a   : > { %vm532_vm13 = vcmp.lt.s32.totalorder %v531_v46, %v529_v45 }
 0x13b   : > { %v533_v47 = vsel %vm532_vm13, %v531_v46, %v529_v45 }
 0x13c   : > { %v534_v48 = vrot.slane %v533_v47, 4 }
 0x13e   : > { %vm535_vm14 = vcmp.lt.s32.totalorder %v533_v47, %v534_v48 }
 0x13f   : > { %v536_v49 = vsel %vm535_vm14, %v533_v47, %v534_v48 }
 0x140   : > { %v537_v50 = vrot.slane %v536_v49, 2 }
 0x142   : > { %vm538_vm15 = vcmp.lt.s32.totalorder %v536_v49, %v537_v50 }
 0x143   : > { %v539_v51 = vsel %vm538_vm15, %v536_v49, %v537_v50 }
 0x144   : > { %v540_v52 = vrot.slane %v539_v51, 1 }
 0x146   : > { %vm541_vm0 = vcmp.lt.s32.totalorder %v539_v51, %v540_v52 }
 0x147   : > { %v542_v53 = vsel %vm541_vm0, %v539_v51, %v540_v52 }
 0x148   : > { %vm544_vm1 = vcmp.eq.s32.totalorder %v1116_v40, %v542_v53  ;;  %vm545_vm2 = vcmp.eq.s32.totalorder %v1119_v42, %v542_v53 }
 0x149   : > { %v547_v54 = vsel %vm544_vm1, -3.4028235e+38, %v508_v26  ;;  %v548_v56 = vsel %vm545_vm2, -3.4028235e+38, %v509_v31 }
 0x14a   : > { %v549_v55 = vmax.f32 %v547_v54, -3.4028235e+38 }
 0x14c   : > { %v550_v57 = vmax.f32 %v549_v55, %v548_v56 }
 0x14e   : > { %v551_v58 = vrot.slane %v550_v57, 4 }
 0x150   : > { %v552_v59 = vmax.f32 %v550_v57, %v551_v58 }
 0x152   : > { %v553_v60 = vrot.slane %v552_v59, 2 }
 0x154   : > { %v554_v62 = vmax.f32 %v552_v59, %v553_v60 }
 0x156   : > { %v555_v63 = vrot.slane %v554_v62, 1 }
 0x158   : > { %v556_v0 = vmax.f32 %v554_v62, %v555_v63 }
 0x15a   : > { %557 = vst [vmem:[#allocation2 + $0x1] sm:$0x1] %v556_v0  ;;  %vm909_vm3 = vcmp.eq.f32.partialorder %v556_v0, -3.4028235e+38  ;;  %vm559_vm4 = vcmp.eq.f32.partialorder %v547_v54, %v556_v0  ;;  %vm560_vm5 = vcmp.eq.f32.partialorder %v548_v56, %v556_v0 }
 0x15b   : > { %v561_v1 = vsel %vm909_vm3, %v1113_v37, 24  ;;  %v562_v2 = vsel %vm559_vm4, %v1116_v40, 24  ;;  %v563_v3 = vsel %vm560_vm5, %v1119_v42, 24 }
 0x15c   : > { %vm564_vm6 = vcmp.lt.s32.totalorder %v561_v1, %v562_v2 }
 0x15d   : > { %v565_v4 = vsel %vm564_vm6, %v561_v1, %v562_v2  ;;  %v668_v2 = vpop.permute.xlu2 %667 }
 0x15e   : > { %vm566_vm7 = vcmp.lt.s32.totalorder %v565_v4, %v563_v3 }
 0x15f   : > { %v567_v5 = vsel %vm566_vm7, %v565_v4, %v563_v3 }
 0x160   : > { %v568_v6 = vrot.slane %v567_v5, 4 }
 0x162   : > { %vm569_vm8 = vcmp.lt.s32.totalorder %v567_v5, %v568_v6 }
 0x163   : > { %v570_v7 = vsel %vm569_vm8, %v567_v5, %v568_v6 }
 0x164   : > { %v571_v8 = vrot.slane %v570_v7, 2 }
 0x166   : > { %vm572_vm9 = vcmp.lt.s32.totalorder %v570_v7, %v571_v8 }
 0x167   : > { %v573_v9 = vsel %vm572_vm9, %v570_v7, %v571_v8 }
 0x168   : > { %v574_v10 = vrot.slane %v573_v9, 1 }
 0x16a   : > { %vm575_vm10 = vcmp.lt.s32.totalorder %v573_v9, %v574_v10 }
 0x16b   : > { %v576_v11 = vsel %vm575_vm10, %v573_v9, %v574_v10 }
 0x16c   : > { %vm578_vm11 = vcmp.eq.s32.totalorder %v1116_v40, %v576_v11  ;;  %vm579_vm12 = vcmp.eq.s32.totalorder %v1119_v42, %v576_v11 }
 0x16d   : > { %v581_v12 = vsel %vm578_vm11, -3.4028235e+38, %v547_v54  ;;  %v582_v14 = vsel %vm579_vm12, -3.4028235e+38, %v548_v56 }
 0x16e   : > { %v583_v13 = vmax.f32 %v581_v12, -3.4028235e+38 }
 0x170   : > { %v584_v15 = vmax.f32 %v583_v13, %v582_v14 }
 0x172   : > { %v585_v16 = vrot.slane %v584_v15, 4 }
 0x174   : > { %v586_v17 = vmax.f32 %v584_v15, %v585_v16 }
 0x176   : > { %v587_v18 = vrot.slane %v586_v17, 2 }
 0x178   : > { %v588_v19 = vmax.f32 %v586_v17, %v587_v18 }
 0x17a   : > { %v589_v20 = vrot.slane %v588_v19, 1 }
 0x17c   : > { %v590_v21 = vmax.f32 %v588_v19, %v589_v20 }
 0x17e   : > { %591 = vst [vmem:[#allocation2 + $0x2] sm:$0x1] %v590_v21  ;;  %vm910_vm13 = vcmp.eq.f32.partialorder %v590_v21, -3.4028235e+38  ;;  %vm593_vm14 = vcmp.eq.f32.partialorder %v581_v12, %v590_v21  ;;  %vm594_vm15 = vcmp.eq.f32.partialorder %v582_v14, %v590_v21 }
 0x17f   : > { %v595_v22 = vsel %vm910_vm13, %v1113_v37, 24  ;;  %v596_v23 = vsel %vm593_vm14, %v1116_v40, 24  ;;  %v597_v24 = vsel %vm594_vm15, %v1119_v42, 24 }
 0x180   : > { %vm598_vm0 = vcmp.lt.s32.totalorder %v595_v22, %v596_v23 }
 0x181   : > { %v599_v25 = vsel %vm598_vm0, %v595_v22, %v596_v23 }
 0x182   : > { %vm600_vm1 = vcmp.lt.s32.totalorder %v599_v25, %v597_v24 }
 0x183   : > { %v601_v26 = vsel %vm600_vm1, %v599_v25, %v597_v24 }
 0x184   : > { %v602_v27 = vrot.slane %v601_v26, 4 }
 0x186   : > { %vm603_vm2 = vcmp.lt.s32.totalorder %v601_v26, %v602_v27 }
 0x187   : > { %v604_v28 = vsel %vm603_vm2, %v601_v26, %v602_v27 }
 0x188   : > { %v605_v29 = vrot.slane %v604_v28, 2 }
 0x18a   : > { %vm606_vm3 = vcmp.lt.s32.totalorder %v604_v28, %v605_v29 }
 0x18b   : > { %v607_v30 = vsel %vm606_vm3, %v604_v28, %v605_v29 }
 0x18c   : > { %v608_v31 = vrot.slane %v607_v30, 1 }
 0x18e   : > { %vm609_vm4 = vcmp.lt.s32.totalorder %v607_v30, %v608_v31 }
 0x18f   : > { %v610_v32 = vsel %vm609_vm4, %v607_v30, %v608_v31 }
 0x190   : > { %vm612_vm5 = vcmp.eq.s32.totalorder %v1116_v40, %v610_v32  ;;  %vm613_vm6 = vcmp.eq.s32.totalorder %v1119_v42, %v610_v32 }
 0x191   : > { %v615_v33 = vsel %vm612_vm5, -3.4028235e+38, %v581_v12  ;;  %v616_v35 = vsel %vm613_vm6, -3.4028235e+38, %v582_v14 }
 0x192   : > { %v617_v34 = vmax.f32 %v615_v33, -3.4028235e+38 }
 0x194   : > { %v618_v36 = vmax.f32 %v617_v34, %v616_v35 }
 0x196   : > { %v619_v38 = vrot.slane %v618_v36, 4 }
 0x198   : > { %v620_v39 = vmax.f32 %v618_v36, %v619_v38 }
 0x19a   : > { %v621_v41 = vrot.slane %v620_v39, 2 }
 0x19c   : > { %v622_v43 = vmax.f32 %v620_v39, %v621_v41 }
 0x19e   : > { %v623_v44 = vrot.slane %v622_v43, 1 }
 0x1a0   : > { %v624_v45 = vmax.f32 %v622_v43, %v623_v44 }
 0x1a2   : > { %625 = vst [vmem:[#allocation2 + $0x3] sm:$0x1] %v624_v45  ;;  %vm911_vm7 = vcmp.eq.f32.partialorder %v624_v45, -3.4028235e+38  ;;  %vm627_vm8 = vcmp.eq.f32.partialorder %v615_v33, %v624_v45  ;;  %vm628_vm9 = vcmp.eq.f32.partialorder %v616_v35, %v624_v45 }
 0x1a3   : > { %v629_v46 = vsel %vm911_vm7, %v1113_v37, 24  ;;  %v630_v47 = vsel %vm627_vm8, %v1116_v40, 24  ;;  %v631_v48 = vsel %vm628_vm9, %v1119_v42, 24 }
 0x1a4   : > { %vm632_vm10 = vcmp.lt.s32.totalorder %v629_v46, %v630_v47 }
 0x1a5   : > { %v633_v49 = vsel %vm632_vm10, %v629_v46, %v630_v47 }
 0x1a6   : > { %vm634_vm11 = vcmp.lt.s32.totalorder %v633_v49, %v631_v48 }
 0x1a7   : > { %v635_v50 = vsel %vm634_vm11, %v633_v49, %v631_v48 }
 0x1a8   : > { %v636_v51 = vrot.slane %v635_v50, 4 }
 0x1aa   : > { %vm637_vm12 = vcmp.lt.s32.totalorder %v635_v50, %v636_v51 }
 0x1ab   : > { %v638_v52 = vsel %vm637_vm12, %v635_v50, %v636_v51 }
 0x1ac   : > { %v639_v53 = vrot.slane %v638_v52, 2 }
 0x1ae   : > { %vm640_vm13 = vcmp.lt.s32.totalorder %v638_v52, %v639_v53 }
 0x1af   : > { %v641_v54 = vsel %vm640_vm13, %v638_v52, %v639_v53 }
 0x1b0   : > { %v642_v55 = vrot.slane %v641_v54, 1 }
 0x1b2   : > { %vm643_vm14 = vcmp.lt.s32.totalorder %v641_v54, %v642_v55 }
 0x1b3   : > { %v644_v56 = vsel %vm643_vm14, %v641_v54, %v642_v55 }
 0x1b4   : > { %vm646_vm15 = vcmp.eq.s32.totalorder %v1116_v40, %v644_v56  ;;  %vm647_vm0 = vcmp.eq.s32.totalorder %v1119_v42, %v644_v56 }
 0x1b5   : > { %v649_v37 = vsel %vm646_vm15, -3.4028235e+38, %v615_v33  ;;  %v650_v58 = vsel %vm647_vm0, -3.4028235e+38, %v616_v35 }
 0x1b6   : > { %v651_v57 = vmax.f32 %v649_v37, -3.4028235e+38 }
 0x1b8   : > { %v652_v59 = vmax.f32 %v651_v57, %v650_v58 }
 0x1ba   : > { %v653_v60 = vrot.slane %v652_v59, 4 }
 0x1bc   : > { %v654_v61 = vmax.f32 %v652_v59, %v653_v60 }
 0x1be   : > { %v655_v62 = vrot.slane %v654_v61, 2 }
 0x1c0   : > { %v656_v63 = vmax.f32 %v654_v61, %v655_v62 }
 0x1c2   : > { %v657_v0 = vrot.slane %v656_v63, 1 }
 0x1c4   : > { %v658_v1 = vmax.f32 %v656_v63, %v657_v0 }
 0x1c6   : > { %659 = vst [vmem:[#allocation2 + $0x4] sm:$0x1] %v658_v1 }
 0x1cd   : > { %v664_v3 = vld [vmem:[#allocation2] sm:$0xff] }
 0x1ce   : > { %v670_v4 = vmul.f32 %v668_v2, %v664_v3 }
 0x1d0   : > { %v671_v5 = vrot.slane %v670_v4, 4 }
 0x1d2   : > { %v672_v40 = vadd.f32 %v671_v5, %v670_v4 }
 0x1d4   : > { %v673_v42 = vrot.slane %v672_v40, 2 }
 0x1d6   : > { %v674_v6 = vadd.f32 %v673_v42, %v672_v40 }
 0x1d8   : > { %v675_v7 = vrot.slane %v674_v6, 1 }
 0x1da   : > { %v676_v8 = vadd.f32 %v675_v7, %v674_v6 }
 0x1dc   : > { %677 = vst [vmem:[%s365_s10] sm:$0x1] %v676_v8 }
 0x1dd   : > { %939 = shalt.err (!%p936_p5)
}
 0x1de   : > { %845 = dma.vmem_to_hbm [thread:$0]  (%p1075_p4), %s691_s12, 16, %s693_s15, %s679_s16  }
 0x1df PF: > { %p851_p6 = scmp.ge.s32.totalorder %s990_s29, 2  ;;  %s704_s17 = sand.u32 1, %s970_s24  }
 0x1e0   : > { %s705_s30 = scalar_lea.sflag [#allocation4], %s704_s17 }
 0x1e1   : > { %p848_p7 = pnand %p851_p6, %p1082_p8 }
 0x1e3   : > { %p849_p9 = pneg %p848_p7 }
 0x1e5   : > { %965 = dma.done.wait (%p849_p9), %s705_s30, 16  }
 0x1e6   : > { %967 = vsyncadd (%p849_p9), %s705_s30, 4294967280  ;;  %s20_s29 = sadd.s32 1, %s990_s29   ;;  %s1192_s24 = smov %s974_s25 }
 0x1e7   : > { %p17_p10 = scmp.ge.s32.totalorder %s20_s29, 4   ;;  %s1193_s25 = smov %s978_s26 }
 0x1e8   : > { %s1194_s26 = smov %s1088_s14  ;;  %s1195_s27 = smov %s986_s28 }
 0x1e9   : > { %s1196_s28 = smov %s1198_s9  ;;  %19 = sbr.rel (!%p17_p10) target bundleno = 4 (0x4), region = 103 }
 0x1ee   :  { %710 = vsyncpa [#allocation4], 1 }
 0x1ef   :  { %712 = vsyncpa [#allocation4 + $0x1], 1 }

</bundles_post_ra>
